<compile_context>
chip_gen: v6e
topology: v6e:2x2x1
jax: 0.10.0
libtpu: 0.0.40
codegen_flags: <defaults>
</compile_context>

<pallas_src>
import functools

import jax
import jax.numpy as jnp
from jax import lax
from jax.experimental import pallas as pl
from jax.experimental.pallas import tpu as pltpu

_LANES = 128
_SUBLANES = 8
_ALIGN = _SUBLANES * _LANES      # 1024-element slab alignment (rows % 8 == 0)
_MAX_TILE_ROWS = 2048            # (2048, 128) f32 tile = 1 MiB per buffer


def _disc_loss_kernel(real_ref, fake_ref, out_r_ref, out_f_ref, *,
                      n_real, n_fake, tile_rows, n_inner):
    c = pl.program_id(0)          # split ("parallel") axis
    i = pl.program_id(1)          # streaming ("arbitrary") reduction axis

    @pl.when(i == 0)
    def _init():
        out_r_ref[...] = jnp.zeros_like(out_r_ref)
        out_f_ref[...] = jnp.zeros_like(out_f_ref)

    # Unclamped logical block index / element offsets of this tile.  The DMA
    # index_map clamps to the last valid block; the mask below zeroes any
    # duplicated or out-of-bounds elements so they contribute exactly 0.
    b = c * n_inner + i
    row0 = b * tile_rows
    rows = lax.broadcasted_iota(jnp.int32, (tile_rows, _LANES), 0)
    cols = lax.broadcasted_iota(jnp.int32, (tile_rows, _LANES), 1)
    eidx = (row0 + rows) * _LANES + cols

    r = real_ref[...].astype(jnp.float32)
    f = fake_ref[...].astype(jnp.float32)
    dr = r - 1.0
    rr = jnp.where(eidx < n_real, dr * dr, 0.0)
    ff = jnp.where(eidx < n_fake, f * f, 0.0)

    # Pure-VPU partial reduction onto the resident (8, 128) output block.
    rr = rr.reshape(tile_rows // _SUBLANES, _SUBLANES, _LANES)
    ff = ff.reshape(tile_rows // _SUBLANES, _SUBLANES, _LANES)
    out_r_ref[...] += jnp.sum(rr, axis=0)
    out_f_ref[...] += jnp.sum(ff, axis=0)


def _to_rows(x):
    """Flatten to a lane-dense (rows, 128) slab with rows % 8 == 0.

    Only pads (with zeros) when x.size is not already a multiple of 1024;
    padded elements are masked out in-kernel, so the pad value is irrelevant."""
    flat = x.reshape(-1)
    n = flat.shape[0]
    padded = max(_ALIGN, -(-n // _ALIGN) * _ALIGN)
    if padded != n:
        flat = jnp.pad(flat, (0, padded - n))
    return flat.reshape(padded // _LANES, _LANES)


def _match_rows(x2d, rows):
    if x2d.shape[0] < rows:   # only when real/fake sizes differ (rare)
        x2d = jnp.pad(x2d, ((0, rows - x2d.shape[0]), (0, 0)))
    return x2d


def _default_num_splits():
    # 2-way "parallel" split only on chips with 2 TensorCores per device
    # (v4 / v5p megacore, v7x); on single-TC v5e / v6e it is pure overhead.
    try:
        kind = jax.devices()[0].device_kind.lower()
    except Exception:
        return 1
    if any(tag in kind for tag in ("v4", "v5p", "7")):
        return 2
    return 1


def discriminator_loss(prob_real_is_real, prob_fake_is_real, *,
                       num_splits=None, max_tile_rows=_MAX_TILE_ROWS):
    n_real = int(prob_real_is_real.size)
    n_fake = int(prob_fake_is_real.size)

    real2d = _to_rows(prob_real_is_real)
    fake2d = _to_rows(prob_fake_is_real)
    rows = max(real2d.shape[0], fake2d.shape[0])
    real2d = _match_rows(real2d, rows)
    fake2d = _match_rows(fake2d, rows)

    tile_rows = min(max_tile_rows, rows)        # multiple of 8, <= rows
    nb = pl.cdiv(rows, tile_rows)               # total streamed blocks
    if num_splits is None:
        num_splits = _default_num_splits()
    num_splits = max(1, min(num_splits, nb))
    n_inner = pl.cdiv(nb, num_splits)

    if num_splits * n_inner == nb:
        def _in_map(c, i):
            return (c * n_inner + i, 0)
    else:
        def _in_map(c, i):
            # Clamp the DMA to a valid block; the kernel masks the duplicate.
            return (jnp.minimum(c * n_inner + i, nb - 1), 0)

    kernel = functools.partial(_disc_loss_kernel, n_real=n_real, n_fake=n_fake,
                               tile_rows=tile_rows, n_inner=n_inner)

    cost = pl.CostEstimate(
        flops=3 * (n_real + n_fake),
        transcendentals=0,
        bytes_accessed=(real2d.size * jnp.dtype(real2d.dtype).itemsize
                        + fake2d.size * jnp.dtype(fake2d.dtype).itemsize
                        + 2 * num_splits * _SUBLANES * _LANES * 4),
    )

    out_real, out_fake = pl.pallas_call(
        kernel,
        out_shape=(
            jax.ShapeDtypeStruct((num_splits * _SUBLANES, _LANES), jnp.float32),
            jax.ShapeDtypeStruct((num_splits * _SUBLANES, _LANES), jnp.float32),
        ),
        grid_spec=pltpu.PrefetchScalarGridSpec(
            num_scalar_prefetch=0,
            grid=(num_splits, n_inner),
            in_specs=[
                pl.BlockSpec((tile_rows, _LANES), _in_map),
                pl.BlockSpec((tile_rows, _LANES), _in_map),
            ],
            out_specs=[
                pl.BlockSpec((_SUBLANES, _LANES), lambda c, i: (c, 0)),
                pl.BlockSpec((_SUBLANES, _LANES), lambda c, i: (c, 0)),
            ],
        ),
        compiler_params=pltpu.CompilerParams(
            dimension_semantics=("parallel", "arbitrary")),
        cost_estimate=cost,
    )(real2d, fake2d)

    sum_real = jnp.sum(out_real)    # tiny (num_splits*8, 128) final reduce
    sum_fake = jnp.sum(out_fake)
    return 0.5 * (sum_real / n_real + sum_fake / n_fake)


if __name__ == "__main__":
    key = jax.random.PRNGKey(0)
    k1, k2, k3, k4 = jax.random.split(key, 4)

    # Discriminator probability maps, NCHW: batch=2, channels=4, spatial=16x16.
    prob_real = jax.random.uniform(k1, (2, 4, 16, 16), dtype=jnp.float32)
    prob_fake = jax.random.uniform(k2, (2, 4, 16, 16), dtype=jnp.float32)

    loss = discriminator_loss(prob_real, prob_fake)
    jax.block_until_ready(loss)
    ref = 0.5 * (jnp.mean((prob_real - 1.0) ** 2) + jnp.mean(prob_fake ** 2))
    assert jnp.allclose(loss, ref, rtol=1e-5, atol=1e-6), (loss, ref)

    # PatchGAN-like shape whose size is NOT a multiple of 128 (masked tail path).
    patch_real = jax.random.uniform(k3, (2, 1, 30, 30), dtype=jnp.float32)
    patch_fake = jax.random.uniform(k4, (2, 1, 30, 30), dtype=jnp.float32)
    loss2 = discriminator_loss(patch_real, patch_fake)
    jax.block_until_ready(loss2)
    ref2 = 0.5 * (jnp.mean((patch_real - 1.0) ** 2) + jnp.mean(patch_fake ** 2))
    assert jnp.allclose(loss2, ref2, rtol=1e-5, atol=1e-6), (loss2, ref2)

    print("KERNEL_OK")
</pallas_src>

<mosaic_0001>
module attributes {stable_mosaic.version = 11 : i64} {
  func.func @_disc_loss_kernel(%arg0: i32, %arg1: i32, %arg2: memref<16x128xf32, #tpu.memory_space<vmem>>, %arg3: memref<16x128xf32, #tpu.memory_space<vmem>>, %arg4: memref<8x128xf32, #tpu.memory_space<vmem>>, %arg5: memref<8x128xf32, #tpu.memory_space<vmem>>) attributes {dimension_semantics = [#tpu.dimension_semantics<parallel>, #tpu.dimension_semantics<arbitrary>], iteration_bounds = array<i64: 1, 1>, scalar_prefetch = 0 : i64, scratch_operands = 0 : i64, tpu.core_type = #tpu.core_type<tc>, window_params = [{transform_indices = @transform_0, window_bounds = array<i64: 16, 128>}, {transform_indices = @transform_1, window_bounds = array<i64: 16, 128>}, {transform_indices = @transform_2, window_bounds = array<i64: 8, 128>}, {transform_indices = @transform_3, window_bounds = array<i64: 8, 128>}]} {
    %c0_i32 = arith.constant 0 : i32
    %0 = arith.cmpi eq, %arg1, %c0_i32 : i32
    %1 = arith.extui %0 : i1 to i32
    %c0_i32_0 = arith.constant 0 : i32
    %2 = arith.cmpi ne, %1, %c0_i32_0 : i32
    scf.if %2 {
      %cst_17 = arith.constant 0.000000e+00 : f32
      %37 = vector.broadcast %cst_17 : f32 to vector<8x128xf32>
      %c0_18 = arith.constant 0 : index
      %c0_19 = arith.constant 0 : index
      %38 = vector.load %arg4[%c0_18, %c0_19] : memref<8x128xf32, #tpu.memory_space<vmem>>, vector<8x128xf32>
      tpu.vector_store %arg4[%c0_18, %c0_19], %37 {strides = array<i32>} : memref<8x128xf32, #tpu.memory_space<vmem>>, vector<8x128xf32>,
      %cst_20 = arith.constant 0.000000e+00 : f32
      %39 = vector.broadcast %cst_20 : f32 to vector<8x128xf32>
      %c0_21 = arith.constant 0 : index
      %c0_22 = arith.constant 0 : index
      %40 = vector.load %arg5[%c0_21, %c0_22] : memref<8x128xf32, #tpu.memory_space<vmem>>, vector<8x128xf32>
      tpu.vector_store %arg5[%c0_21, %c0_22], %39 {strides = array<i32>} : memref<8x128xf32, #tpu.memory_space<vmem>>, vector<8x128xf32>,
    } else {
    }
    %c1_i32 = arith.constant 1 : i32
    %3 = arith.muli %arg0, %c1_i32 : i32
    %4 = arith.addi %3, %arg1 : i32
    %c16_i32 = arith.constant 16 : i32
    %5 = arith.muli %4, %c16_i32 : i32
    %6 = tpu.iota {dimensions = array<i32: 0>} : vector<16x128xi32>
    %7 = tpu.iota {dimensions = array<i32: 1>} : vector<16x128xi32>
    %8 = vector.broadcast %5 : i32 to vector<16x128xi32>
    %9 = arith.addi %8, %6 : vector<16x128xi32>
    %c128_i32 = arith.constant 128 : i32
    %10 = vector.broadcast %c128_i32 : i32 to vector<16x128xi32>
    %11 = arith.muli %9, %10 : vector<16x128xi32>
    %12 = arith.addi %11, %7 : vector<16x128xi32>
    %c0 = arith.constant 0 : index
    %c0_1 = arith.constant 0 : index
    %13 = vector.load %arg2[%c0, %c0_1] : memref<16x128xf32, #tpu.memory_space<vmem>>, vector<16x128xf32>
    %c0_2 = arith.constant 0 : index
    %c0_3 = arith.constant 0 : index
    %14 = vector.load %arg3[%c0_2, %c0_3] : memref<16x128xf32, #tpu.memory_space<vmem>>, vector<16x128xf32>
    %cst = arith.constant 1.000000e+00 : f32
    %15 = vector.broadcast %cst : f32 to vector<16x128xf32>
    %16 = arith.subf %13, %15 : vector<16x128xf32>
    %c2048_i32 = arith.constant 2048 : i32
    %17 = vector.broadcast %c2048_i32 : i32 to vector<16x128xi32>
    %18 = arith.cmpi slt, %12, %17 : vector<16x128xi32>
    %19 = arith.mulf %16, %16 : vector<16x128xf32>
    %cst_4 = arith.constant 0.000000e+00 : f32
    %20 = vector.broadcast %cst_4 : f32 to vector<16x128xf32>
    %21 = arith.select %18, %19, %20 : vector<16x128xi1>, vector<16x128xf32>
    %c2048_i32_5 = arith.constant 2048 : i32
    %22 = vector.broadcast %c2048_i32_5 : i32 to vector<16x128xi32>
    %23 = arith.cmpi slt, %12, %22 : vector<16x128xi32>
    %24 = arith.mulf %14, %14 : vector<16x128xf32>
    %cst_6 = arith.constant 0.000000e+00 : f32
    %25 = vector.broadcast %cst_6 : f32 to vector<16x128xf32>
    %26 = arith.select %23, %24, %25 : vector<16x128xi1>, vector<16x128xf32>
    %27 = vector.shape_cast %21 : vector<16x128xf32> to vector<2x8x128xf32>
    %28 = vector.shape_cast %26 : vector<16x128xf32> to vector<2x8x128xf32>
    %c0_7 = arith.constant 0 : index
    %c0_8 = arith.constant 0 : index
    %29 = vector.load %arg4[%c0_7, %c0_8] : memref<8x128xf32, #tpu.memory_space<vmem>>, vector<8x128xf32>
    %cst_9 = arith.constant dense<0.000000e+00> : vector<8x128xf32>
    %30 = vector.multi_reduction <add>, %27, %cst_9 [0] : vector<2x8x128xf32> to vector<8x128xf32>
    %31 = arith.addf %29, %30 : vector<8x128xf32>
    %c0_10 = arith.constant 0 : index
    %c0_11 = arith.constant 0 : index
    %32 = vector.load %arg4[%c0_10, %c0_11] : memref<8x128xf32, #tpu.memory_space<vmem>>, vector<8x128xf32>
    tpu.vector_store %arg4[%c0_10, %c0_11], %31 {strides = array<i32>} : memref<8x128xf32, #tpu.memory_space<vmem>>, vector<8x128xf32>,
    %c0_12 = arith.constant 0 : index
    %c0_13 = arith.constant 0 : index
    %33 = vector.load %arg5[%c0_12, %c0_13] : memref<8x128xf32, #tpu.memory_space<vmem>>, vector<8x128xf32>
    %cst_14 = arith.constant dense<0.000000e+00> : vector<8x128xf32>
    %34 = vector.multi_reduction <add>, %28, %cst_14 [0] : vector<2x8x128xf32> to vector<8x128xf32>
    %35 = arith.addf %33, %34 : vector<8x128xf32>
    %c0_15 = arith.constant 0 : index
    %c0_16 = arith.constant 0 : index
    %36 = vector.load %arg5[%c0_15, %c0_16] : memref<8x128xf32, #tpu.memory_space<vmem>>, vector<8x128xf32>
    tpu.vector_store %arg5[%c0_15, %c0_16], %35 {strides = array<i32>} : memref<8x128xf32, #tpu.memory_space<vmem>>, vector<8x128xf32>,
    return
  }
  func.func @transform_0(%arg0: i32, %arg1: i32) -> (i32, i32) {
    %c1_i32 = arith.constant 1 : i32
    %0 = arith.muli %arg0, %c1_i32 : i32
    %1 = arith.addi %0, %arg1 : i32
    %c0_i32 = arith.constant 0 : i32
    %c0_i32_0 = arith.constant 0 : i32
    return %1, %c0_i32 : i32, i32
  }
  func.func @transform_1(%arg0: i32, %arg1: i32) -> (i32, i32) {
    %c1_i32 = arith.constant 1 : i32
    %0 = arith.muli %arg0, %c1_i32 : i32
    %1 = arith.addi %0, %arg1 : i32
    %c0_i32 = arith.constant 0 : i32
    %c0_i32_0 = arith.constant 0 : i32
    return %1, %c0_i32 : i32, i32
  }
  func.func @transform_2(%arg0: i32, %arg1: i32) -> (i32, i32) {
    %c0_i32 = arith.constant 0 : i32
    %c0_i32_0 = arith.constant 0 : i32
    return %arg0, %c0_i32 : i32, i32
  }
  func.func @transform_3(%arg0: i32, %arg1: i32) -> (i32, i32) {
    %c0_i32 = arith.constant 0 : i32
    %c0_i32_0 = arith.constant 0 : i32
    return %arg0, %c0_i32 : i32, i32
  }
}

</mosaic_0001>

<bundles_post_ra>
// kernel: tpu_custom_call.1
= control target key start
LH: loop header
LB: loop body
LE: loop exit
PB: predicated region body
PF: predicated region fallthrough
CT: control target
= control target key end

     0   :  { %9 = vsyncpa [#allocation3], 0  ;;  %s264_s0 = inlined_call_operand.hbm [shape: f32[16,128], index: 0, kind: input, shape index: {}]   ;;  %s265_s1 = inlined_call_operand.hbm [shape: f32[16,128], index: 1, kind: input, shape index: {}]   ;;  %s266_s2 = inlined_call_operand.hbm [shape: f32[8,128], index: 2, kind: output, shape index: {0}]   ;;  %s267_s3 = inlined_call_operand.hbm [shape: f32[8,128], index: 3, kind: output, shape index: {1}]  }
   0x1   :  { %10 = vsyncpa [#allocation6], 0 }
   0x2   :  { %11 = vsyncpa [#allocation4], 0 }
   0x3   :  { %12 = vsyncpa [#allocation9], 0  ;;  %s226_s12 = smov [#allocation2]  }
   0x4   :  { %s22_s13 = sshll.u32 %s226_s12, 4  ;;  %s23_s13 = int_to_ptr.vmem [resolvable:$true] %s22_s13 }
   0x5   :  { %s146_s14 = scalar_lea.vmem %s23_s13, 256  ;;  %p151_p1 = scmp.lt.s32.totalorder %s23_s13, %s23_s13 }
   0x6   :  { %p147_p0 = scmp.ne.s32.totalorder %s23_s13, %s146_s14  ;;  %p152_p2 = scmp.lt.s32.totalorder %s146_s14, %s146_s14 }
   0x8   :  { %p153_p3 = por %p152_p2, %p151_p1 }
   0xa   :  { %p154_p4 = pnand %p153_p3, %p147_p0 }
   0xc   :  { %157 = shalt.err (!%p154_p4)
}
   0xd   :  { %s227_s15 = smov 128   ;;  %s228_s16 = smov 8  }
   0xe   :  { %28 = dma.hbm_to_vmem [thread:$0]  %s264_s0, 256, %s23_s13, [#allocation3], %s227_s15, %s227_s15, %s228_s16  }
   0xf   :  { %s229_s19 = smov [#allocation5]  }
  0x10   :  { %s38_s20 = sshll.u32 %s229_s19, 4  ;;  %s39_s20 = int_to_ptr.vmem [resolvable:$true] %s38_s20 }
  0x11   :  { %s166_s21 = scalar_lea.vmem %s39_s20, 256  ;;  %p171_p6 = scmp.lt.s32.totalorder %s39_s20, %s39_s20 }
  0x12   :  { %p167_p5 = scmp.ne.s32.totalorder %s39_s20, %s166_s21  ;;  %p172_p7 = scmp.lt.s32.totalorder %s166_s21, %s166_s21 }
  0x14   :  { %p173_p8 = por %p172_p7, %p171_p6 }
  0x16   :  { %p174_p9 = pnand %p173_p8, %p167_p5 }
  0x18   :  { %177 = shalt.err (!%p174_p9)
}
  0x19   :  { %44 = dma.hbm_to_vmem [thread:$0]  %s265_s1, 256, %s39_s20, [#allocation6], %s227_s15, %s227_s15, %s228_s16  }
  0x1a   :  { %218 = dma.done.wait [#allocation3], 256  }
  0x1b   :  { %219 = vsyncadd [#allocation3], 4294967040 }
  0x1c   :  { %220 = dma.done.wait [#allocation6], 256  }
  0x1d   :  { %221 = vsyncadd [#allocation6], 4294967040  ;;  %v63_v0 = vlaneseq  ;;  %v75_v7 = vld [vmem:[#allocation2] sm:$0xff]  ;;  %v76_v8 = vld [vmem:[#allocation2 + $0x8] sm:$0xff]  ;;  %s230_s0 = smov [#allocation8]   ;;  %s231_s24 = smov [#allocation7]  }
  0x1e   :  { %v77_v9 = vld [vmem:[#allocation5] sm:$0xff]  ;;  %v129_v11 = vadd.f32 -1.0, %v75_v7  ;;  %v130_v12 = vadd.f32 -1.0, %v76_v8  ;;  %v78_v13 = vld [vmem:[#allocation5 + $0x8] sm:$0xff]  ;;  %s115_s1 = sshll.u32 %s230_s0, 4  ;;  %s105_s25 = sshll.u32 %s231_s24, 4  ;;  %s116_s1 = int_to_ptr.vmem [resolvable:$true] %s115_s1  ;;  %s106_s25 = int_to_ptr.vmem [resolvable:$true] %s105_s25 }
  0x1f   :  { %v64_v1 = vshrl.u32 %v63_v0, 7  ;;  %v67_v2 = vand.u32 127, %v63_v0  ;;  %v87_v14 = vmul.f32 %v77_v9, %v77_v9  ;;  %v88_v15 = vmul.f32 %v78_v13, %v78_v13  ;;  %s178_s26 = scalar_lea.vmem %s116_s1, 128  ;;  %p183_p11 = scmp.lt.s32.totalorder %s116_s1, %s116_s1 }
  0x20   :  { %v83_v16 = vmul.f32 %v129_v11, %v129_v11  ;;  %v84_v17 = vmul.f32 %v130_v12, %v130_v12  ;;  %p179_p10 = scmp.ne.s32.totalorder %s116_s1, %s178_s26  ;;  %p184_p12 = scmp.lt.s32.totalorder %s178_s26, %s178_s26 }
  0x21   :  { %v65_v3 = vadd.s32 8, %v64_v1  ;;  %v71_v4 = vmul.u32 128, %v64_v1 }
  0x22   :  { %p185_p13 = por %p184_p12, %p183_p11 }
  0x23   :  { %v72_v5 = vmul.u32 128, %v65_v3  ;;  %v73_v6 = vadd.s32 %v71_v4, %v67_v2 }
  0x24   :  { %p186_p0 = pnand %p185_p13, %p179_p10 }
  0x25   :  { %v74_v10 = vadd.s32 %v72_v5, %v67_v2  ;;  %vm81_vm0 = vcmp.lt.s32.totalorder %v73_v6, 2048 }
  0x26   :  { %v89_v18 = vsel %vm81_vm0, %v87_v14, 0.0  ;;  %v85_v20 = vsel %vm81_vm0, %v83_v16, 0.0 }
  0x27   :  { %vm82_vm1 = vcmp.lt.s32.totalorder %v74_v10, 2048 }
  0x28   :  { %v90_v19 = vsel %vm82_vm1, %v88_v15, 0.0  ;;  %v86_v21 = vsel %vm82_vm1, %v84_v17, 0.0 }
  0x29   :  { %v96_v22 = vadd.f32 %v90_v19, %v89_v18  ;;  %v92_v23 = vadd.f32 %v86_v21, %v85_v20 }
  0x2b   :  { %98 = vst [vmem:[#allocation8] sm:$0xff] %v96_v22  ;;  %94 = vst [vmem:[#allocation7] sm:$0xff] %v92_v23 }
  0x2c   :  { %189 = shalt.err (!%p186_p0)
}
  0x2d   :  { %118 = dma.vmem_to_hbm [thread:$0]  %s116_s1, 128, %s267_s3, [#allocation9]  }
  0x2e   :  { %s198_s29 = scalar_lea.vmem %s106_s25, 128  ;;  %p203_p2 = scmp.lt.s32.totalorder %s106_s25, %s106_s25 }
  0x2f   :  { %p199_p1 = scmp.ne.s32.totalorder %s106_s25, %s198_s29  ;;  %p204_p3 = scmp.lt.s32.totalorder %s198_s29, %s198_s29 }
  0x31   :  { %p205_p4 = por %p204_p3, %p203_p2 }
  0x33   :  { %p206_p5 = pnand %p205_p4, %p199_p1 }
  0x35   :  { %209 = shalt.err (!%p206_p5)
}
  0x36   :  { %108 = dma.vmem_to_hbm [thread:$0]  %s106_s25, 128, %s266_s2, [#allocation4]  }
  0x37   :  { %222 = dma.done.wait [#allocation4], 128  }
  0x38   :  { %223 = vsyncadd [#allocation4], 4294967168 }
  0x39   :  { %224 = dma.done.wait [#allocation9], 128  }
  0x3a   :  { %225 = vsyncadd [#allocation9], 4294967168 }
  0x3b   :  { %125 = vsyncpa [#allocation3], 1 }
  0x3c   :  { %126 = vsyncpa [#allocation6], 1 }
  0x3d   :  { %127 = vsyncpa [#allocation4], 1 }
  0x3e   :  { %128 = vsyncpa [#allocation9], 1 }

</bundles_post_ra>
